<compile_context>
chip_gen: v7x
topology: tpu7x:2x2x1
jax: 0.10.0
libtpu: 0.0.40
codegen_flags: <defaults>
</compile_context>

<pallas_src>
import jax
import jax.numpy as jnp
from jax.experimental import pallas as pl
from jax.experimental.pallas import tpu as pltpu

LANE = 128  # TPU lane width; output columns padded to this for dense stores.


def _round_up(x, m):
    return ((x + m - 1) // m) * m


# ----------------------------------------------------------------------------
# Pallas kernel: one batch-block of rows through the full 3-layer MLP.
#   logits = (tanh(tanh([s|a] @ W1 + b1) @ W2 + b2)) @ W3 + b3
# with the concat fused as  s @ W1s + a @ W1a.
# ----------------------------------------------------------------------------
def mappo_actor_kernel(s_ref, aid_ref, w1s_ref, w1a_ref, b1_ref,
                       w2_ref, b2_ref, w3_ref, b3_ref, out_ref):
    # Inputs arrive f32 (single HBM pass); cast to bf16 only for the MXU dots.
    s = s_ref[...].astype(jnp.bfloat16)
    aid = aid_ref[...].astype(jnp.bfloat16)

    # fc1 with the concat fused:  [s | aid] @ W1 == s @ W1s + aid @ W1a
    h1 = jnp.dot(s, w1s_ref[...], preferred_element_type=jnp.float32)
    h1 = h1 + jnp.dot(aid, w1a_ref[...], preferred_element_type=jnp.float32)
    h1 = jnp.tanh(h1 + b1_ref[...])                      # f32 bias + tanh

    # fc2 + tanh
    h2 = jnp.dot(h1.astype(jnp.bfloat16), w2_ref[...],
                 preferred_element_type=jnp.float32)
    h2 = jnp.tanh(h2 + b2_ref[...])

    # fc3 (lane-padded to 128 output columns -> unmasked, lane-dense store)
    logits = jnp.dot(h2.astype(jnp.bfloat16), w3_ref[...],
                     preferred_element_type=jnp.float32)
    out_ref[...] = (logits + b3_ref[...]).astype(out_ref.dtype)


# ----------------------------------------------------------------------------
# Wrapper: batch-tiled pallas_call with resident (grid-invariant) weights.
# ----------------------------------------------------------------------------
def mappo_actor_forward(state, agent_id, kparams, *, block_b=512):
    w1s = kparams["w1s"]
    w1a = kparams["w1a"]
    b1 = kparams["b1"]
    w2 = kparams["w2"]
    b2 = kparams["b2"]
    w3p = kparams["w3"]
    b3p = kparams["b3"]
    action_dim = kparams["action_dim"]

    batch = state.shape[0]
    state_dim = state.shape[1]
    num_agents = agent_id.shape[1]
    n_out = w3p.shape[1]  # lane-padded output width (multiple of 128)

    # Batch block: multiple of 8 (sublanes), capped by block_b; pad the batch
    # so the grid divides evenly (padded rows are zeros and sliced off).
    bb = _round_up(min(block_b, _round_up(batch, 8)), 8)
    padded = _round_up(batch, bb)
    if padded != batch:
        pad = padded - batch
        state = jnp.pad(state, ((0, pad), (0, 0)))
        agent_id = jnp.pad(agent_id, ((0, pad), (0, 0)))

    grid = (padded // bb,)

    def row_spec(d):
        return pl.BlockSpec((bb, d), lambda i: (i, 0))

    def resident_spec(shape):
        # Weights / biases: same block for every grid step -> stay in VMEM.
        return pl.BlockSpec(shape, lambda i: (0, 0))

    out = pl.pallas_call(
        mappo_actor_kernel,
        out_shape=jax.ShapeDtypeStruct((padded, n_out), jnp.float32),
        grid=grid,
        in_specs=[
            row_spec(state_dim),
            row_spec(num_agents),
            resident_spec(w1s.shape),
            resident_spec(w1a.shape),
            resident_spec(b1.shape),
            resident_spec(w2.shape),
            resident_spec(b2.shape),
            resident_spec(w3p.shape),
            resident_spec(b3p.shape),
        ],
        out_specs=pl.BlockSpec((bb, n_out), lambda i: (i, 0)),
        compiler_params=pltpu.CompilerParams(
            dimension_semantics=("parallel",)),
    )(state, agent_id, w1s, w1a, b1, w2, b2, w3p, b3p)

    return out[:batch, :action_dim]


# ----------------------------------------------------------------------------
# Parameter init (mirrors nn.init.orthogonal_ weights / zero biases)
# ----------------------------------------------------------------------------
def orthogonal_init(key, out_dim, in_dim):
    # PyTorch orthogonal_ on an (out, in) weight; stored transposed (in, out)
    # so the kernel computes x @ W directly.
    a = jax.random.normal(key, (max(out_dim, in_dim), min(out_dim, in_dim)),
                          dtype=jnp.float32)
    q, r = jnp.linalg.qr(a)
    d = jnp.diag(r)
    q = q * jnp.where(d == 0, 1.0, jnp.sign(d))  # deterministic, 0-safe
    w = q if out_dim >= in_dim else q.T          # (out, in)
    return w.T                                   # (in, out), f32


def make_params_f32(key, state_dim, num_agents, hidden_dim, action_dim):
    in_dim = state_dim + num_agents
    k1, k2, k3 = jax.random.split(key, 3)
    w1 = orthogonal_init(k1, hidden_dim[0], in_dim)          # (in_dim, h1)
    w2 = orthogonal_init(k2, hidden_dim[1], hidden_dim[0])   # (h1, h2)
    w3 = orthogonal_init(k3, action_dim, hidden_dim[1])      # (h2, act)
    b1 = jnp.zeros((1, hidden_dim[0]), jnp.float32)
    b2 = jnp.zeros((1, hidden_dim[1]), jnp.float32)
    b3 = jnp.zeros((1, action_dim), jnp.float32)
    return (w1, b1, w2, b2, w3, b3)


def make_kernel_params(params_f32, state_dim, action_dim):
    """One-time prep: split W1, bf16 weights, lane-pad fc3 to 128 columns."""
    w1, b1, w2, b2, w3, b3 = params_f32
    n_out = _round_up(action_dim, LANE)
    w3p = jnp.zeros((w3.shape[0], n_out), jnp.float32).at[:, :action_dim].set(w3)
    b3p = jnp.zeros((1, n_out), jnp.float32).at[:, :action_dim].set(b3)
    return dict(
        w1s=w1[:state_dim].astype(jnp.bfloat16),   # (state_dim, h1)
        w1a=w1[state_dim:].astype(jnp.bfloat16),   # (num_agents, h1)
        b1=b1,                                     # f32
        w2=w2.astype(jnp.bfloat16),
        b2=b2,
        w3=w3p.astype(jnp.bfloat16),
        b3=b3p,
        action_dim=action_dim,
    )


# ----------------------------------------------------------------------------
# Pure-JAX references
# ----------------------------------------------------------------------------
def reference_forward_f32(state, agent_id, params_f32):
    w1, b1, w2, b2, w3, b3 = params_f32
    x = jnp.concatenate([state, agent_id], axis=-1)
    x = jnp.tanh(x @ w1 + b1)
    x = jnp.tanh(x @ w2 + b2)
    return x @ w3 + b3


def reference_forward_bf16(state, agent_id, kp):
    s = state.astype(jnp.bfloat16)
    a = agent_id.astype(jnp.bfloat16)
    h1 = (jnp.dot(s, kp["w1s"], preferred_element_type=jnp.float32)
          + jnp.dot(a, kp["w1a"], preferred_element_type=jnp.float32))
    h1 = jnp.tanh(h1 + kp["b1"])
    h2 = jnp.tanh(jnp.dot(h1.astype(jnp.bfloat16), kp["w2"],
                          preferred_element_type=jnp.float32) + kp["b2"])
    out = jnp.dot(h2.astype(jnp.bfloat16), kp["w3"],
                  preferred_element_type=jnp.float32) + kp["b3"]
    return out[:, :kp["action_dim"]]


if __name__ == "__main__":
    # Small shapes consistent with the module.
    batch = 8
    state_dim = 12
    num_agents = 4           # agent_id is a one-hot of length num_agents
    hidden_dim = (32, 32)    # params.actor_hidden_dim
    action_dim = 6

    key = jax.random.PRNGKey(0)
    k_state, k_agent, k_params = jax.random.split(key, 3)

    state = jax.random.normal(k_state, (batch, state_dim), jnp.float32)
    agent_idx = jax.random.randint(k_agent, (batch,), 0, num_agents)
    agent_id = jax.nn.one_hot(agent_idx, num_agents, dtype=jnp.float32)

    params_f32 = make_params_f32(k_params, state_dim, num_agents,
                                 hidden_dim, action_dim)
    kparams = make_kernel_params(params_f32, state_dim, action_dim)

    logits = mappo_actor_forward(state, agent_id, kparams)
    logits = jax.block_until_ready(logits)
    assert logits.shape == (batch, action_dim)

    # Tight check vs. a bf16-matched pure-JAX reference.
    ref_bf16 = reference_forward_bf16(state, agent_id, kparams)
    assert jnp.allclose(logits, ref_bf16, atol=2e-3, rtol=2e-3), \
        "mismatch vs bf16-matched reference"

    # Loose check vs. the full-f32 PyTorch-equivalent reference.
    ref_f32 = reference_forward_f32(state, agent_id, params_f32)
    assert jnp.allclose(logits, ref_f32, atol=5e-2, rtol=5e-2), \
        "mismatch vs f32 reference"

    print("KERNEL_OK")
</pallas_src>

<mosaic_0001>
module attributes {stable_mosaic.version = 11 : i64} {
  func.func @mappo_actor_kernel(%arg0: i32, %arg1: memref<8x12xf32, #tpu.memory_space<vmem>>, %arg2: memref<8x4xf32, #tpu.memory_space<vmem>>, %arg3: memref<12x32xbf16, #tpu.memory_space<vmem>>, %arg4: memref<4x32xbf16, #tpu.memory_space<vmem>>, %arg5: memref<1x32xf32, #tpu.memory_space<vmem>>, %arg6: memref<32x32xbf16, #tpu.memory_space<vmem>>, %arg7: memref<1x32xf32, #tpu.memory_space<vmem>>, %arg8: memref<32x128xbf16, #tpu.memory_space<vmem>>, %arg9: memref<1x128xf32, #tpu.memory_space<vmem>>, %arg10: memref<8x128xf32, #tpu.memory_space<vmem>>) attributes {dimension_semantics = [#tpu.dimension_semantics<parallel>], iteration_bounds = array<i64: 1>, scalar_prefetch = 0 : i64, scratch_operands = 0 : i64, tpu.core_type = #tpu.core_type<tc>, window_params = [{transform_indices = @transform_0, window_bounds = array<i64: 8, 12>}, {transform_indices = @transform_1, window_bounds = array<i64: 8, 4>}, {pipeline_mode = #tpu.pipeline_mode<synchronous>, transform_indices = @transform_2, window_bounds = array<i64: 12, 32>}, {pipeline_mode = #tpu.pipeline_mode<synchronous>, transform_indices = @transform_3, window_bounds = array<i64: 4, 32>}, {pipeline_mode = #tpu.pipeline_mode<synchronous>, transform_indices = @transform_4, window_bounds = array<i64: 1, 32>}, {pipeline_mode = #tpu.pipeline_mode<synchronous>, transform_indices = @transform_5, window_bounds = array<i64: 32, 32>}, {pipeline_mode = #tpu.pipeline_mode<synchronous>, transform_indices = @transform_6, window_bounds = array<i64: 1, 32>}, {pipeline_mode = #tpu.pipeline_mode<synchronous>, transform_indices = @transform_7, window_bounds = array<i64: 32, 128>}, {pipeline_mode = #tpu.pipeline_mode<synchronous>, transform_indices = @transform_8, window_bounds = array<i64: 1, 128>}, {transform_indices = @transform_9, window_bounds = array<i64: 8, 128>}]} {
    %c0 = arith.constant 0 : index
    %c0_0 = arith.constant 0 : index
    %0 = vector.load %arg1[%c0, %c0_0] : memref<8x12xf32, #tpu.memory_space<vmem>>, vector<8x12xf32>
    %1 = arith.truncf %0 : vector<8x12xf32> to vector<8x12xbf16>
    %c0_1 = arith.constant 0 : index
    %c0_2 = arith.constant 0 : index
    %2 = vector.load %arg2[%c0_1, %c0_2] : memref<8x4xf32, #tpu.memory_space<vmem>>, vector<8x4xf32>
    %3 = arith.truncf %2 : vector<8x4xf32> to vector<8x4xbf16>
    %c0_3 = arith.constant 0 : index
    %c0_4 = arith.constant 0 : index
    %4 = vector.load %arg3[%c0_3, %c0_4] : memref<12x32xbf16, #tpu.memory_space<vmem>>, vector<12x32xbf16>
    %cst = arith.constant dense<0.000000e+00> : vector<8x32xf32>
    %5 = tpu.matmul %1, %4, %cst {dimension_numbers = #tpu.dot_dimension_numbers<[1], [0], [0], [1], [0, 0, 1, 1], [], []>} : vector<8x12xbf16>, vector<12x32xbf16>, vector<8x32xf32> -> vector<8x32xf32>
    %c0_5 = arith.constant 0 : index
    %c0_6 = arith.constant 0 : index
    %6 = vector.load %arg4[%c0_5, %c0_6] : memref<4x32xbf16, #tpu.memory_space<vmem>>, vector<4x32xbf16>
    %cst_7 = arith.constant dense<0.000000e+00> : vector<8x32xf32>
    %7 = tpu.matmul %3, %6, %cst_7 {dimension_numbers = #tpu.dot_dimension_numbers<[1], [0], [0], [1], [0, 0, 1, 1], [], []>} : vector<8x4xbf16>, vector<4x32xbf16>, vector<8x32xf32> -> vector<8x32xf32>
    %8 = arith.addf %5, %7 : vector<8x32xf32>
    %c0_8 = arith.constant 0 : index
    %c0_9 = arith.constant 0 : index
    %9 = vector.load %arg5[%c0_8, %c0_9] : memref<1x32xf32, #tpu.memory_space<vmem>>, vector<1x32xf32>
    %10 = vector.broadcast %9 : vector<1x32xf32> to vector<8x32xf32>
    %11 = arith.addf %8, %10 : vector<8x32xf32>
    %12 = math.tanh %11 : vector<8x32xf32>
    %13 = arith.truncf %12 : vector<8x32xf32> to vector<8x32xbf16>
    %c0_10 = arith.constant 0 : index
    %c0_11 = arith.constant 0 : index
    %14 = vector.load %arg6[%c0_10, %c0_11] : memref<32x32xbf16, #tpu.memory_space<vmem>>, vector<32x32xbf16>
    %cst_12 = arith.constant dense<0.000000e+00> : vector<8x32xf32>
    %15 = tpu.matmul %13, %14, %cst_12 {dimension_numbers = #tpu.dot_dimension_numbers<[1], [0], [0], [1], [0, 0, 1, 1], [], []>} : vector<8x32xbf16>, vector<32x32xbf16>, vector<8x32xf32> -> vector<8x32xf32>
    %c0_13 = arith.constant 0 : index
    %c0_14 = arith.constant 0 : index
    %16 = vector.load %arg7[%c0_13, %c0_14] : memref<1x32xf32, #tpu.memory_space<vmem>>, vector<1x32xf32>
    %17 = vector.broadcast %16 : vector<1x32xf32> to vector<8x32xf32>
    %18 = arith.addf %15, %17 : vector<8x32xf32>
    %19 = math.tanh %18 : vector<8x32xf32>
    %20 = arith.truncf %19 : vector<8x32xf32> to vector<8x32xbf16>
    %c0_15 = arith.constant 0 : index
    %c0_16 = arith.constant 0 : index
    %21 = vector.load %arg8[%c0_15, %c0_16] : memref<32x128xbf16, #tpu.memory_space<vmem>>, vector<32x128xbf16>
    %cst_17 = arith.constant dense<0.000000e+00> : vector<8x128xf32>
    %22 = tpu.matmul %20, %21, %cst_17 {dimension_numbers = #tpu.dot_dimension_numbers<[1], [0], [0], [1], [0, 0, 1, 1], [], []>} : vector<8x32xbf16>, vector<32x128xbf16>, vector<8x128xf32> -> vector<8x128xf32>
    %c0_18 = arith.constant 0 : index
    %c0_19 = arith.constant 0 : index
    %23 = vector.load %arg9[%c0_18, %c0_19] : memref<1x128xf32, #tpu.memory_space<vmem>>, vector<1x128xf32>
    %24 = vector.broadcast %23 : vector<1x128xf32> to vector<8x128xf32>
    %25 = arith.addf %22, %24 : vector<8x128xf32>
    %c0_20 = arith.constant 0 : index
    %c0_21 = arith.constant 0 : index
    %26 = vector.load %arg10[%c0_20, %c0_21] : memref<8x128xf32, #tpu.memory_space<vmem>>, vector<8x128xf32>
    tpu.vector_store %arg10[%c0_20, %c0_21], %25 {strides = array<i32>} : memref<8x128xf32, #tpu.memory_space<vmem>>, vector<8x128xf32>,
    return
  }
  func.func @transform_0(%arg0: i32) -> (i32, i32) {
    %c0_i32 = arith.constant 0 : i32
    %c0_i32_0 = arith.constant 0 : i32
    return %arg0, %c0_i32 : i32, i32
  }
  func.func @transform_1(%arg0: i32) -> (i32, i32) {
    %c0_i32 = arith.constant 0 : i32
    %c0_i32_0 = arith.constant 0 : i32
    return %arg0, %c0_i32 : i32, i32
  }
  func.func @transform_2(%arg0: i32) -> (i32, i32) {
    %c0_i32 = arith.constant 0 : i32
    %c0_i32_0 = arith.constant 0 : i32
    %c0_i32_1 = arith.constant 0 : i32
    return %c0_i32, %c0_i32_0 : i32, i32
  }
  func.func @transform_3(%arg0: i32) -> (i32, i32) {
    %c0_i32 = arith.constant 0 : i32
    %c0_i32_0 = arith.constant 0 : i32
    %c0_i32_1 = arith.constant 0 : i32
    return %c0_i32, %c0_i32_0 : i32, i32
  }
  func.func @transform_4(%arg0: i32) -> (i32, i32) {
    %c0_i32 = arith.constant 0 : i32
    %c0_i32_0 = arith.constant 0 : i32
    %c0_i32_1 = arith.constant 0 : i32
    return %c0_i32, %c0_i32_0 : i32, i32
  }
  func.func @transform_5(%arg0: i32) -> (i32, i32) {
    %c0_i32 = arith.constant 0 : i32
    %c0_i32_0 = arith.constant 0 : i32
    %c0_i32_1 = arith.constant 0 : i32
    return %c0_i32, %c0_i32_0 : i32, i32
  }
  func.func @transform_6(%arg0: i32) -> (i32, i32) {
    %c0_i32 = arith.constant 0 : i32
    %c0_i32_0 = arith.constant 0 : i32
    %c0_i32_1 = arith.constant 0 : i32
    return %c0_i32, %c0_i32_0 : i32, i32
  }
  func.func @transform_7(%arg0: i32) -> (i32, i32) {
    %c0_i32 = arith.constant 0 : i32
    %c0_i32_0 = arith.constant 0 : i32
    %c0_i32_1 = arith.constant 0 : i32
    return %c0_i32, %c0_i32_0 : i32, i32
  }
  func.func @transform_8(%arg0: i32) -> (i32, i32) {
    %c0_i32 = arith.constant 0 : i32
    %c0_i32_0 = arith.constant 0 : i32
    %c0_i32_1 = arith.constant 0 : i32
    return %c0_i32, %c0_i32_0 : i32, i32
  }
  func.func @transform_9(%arg0: i32) -> (i32, i32) {
    %c0_i32 = arith.constant 0 : i32
    %c0_i32_0 = arith.constant 0 : i32
    return %arg0, %c0_i32 : i32, i32
  }
}

</mosaic_0001>

<bundles_post_ra>
// kernel: tpu_custom_call.1
= control target key start
LH: loop header
LB: loop body
LE: loop exit
PB: predicated region body
PF: predicated region fallthrough
CT: control target
= control target key end

     0   :  { %14 = vsyncpa [#allocation3], 0  ;;  %s686_s0 = inlined_call_operand.hbm [shape: f32[8,12], index: 0, kind: input, shape index: {}]   ;;  %s687_s1 = inlined_call_operand.vmem [shape: f32[8,4], index: 1, kind: input, shape index: {}]   ;;  %s688_s2 = inlined_call_operand.hbm [shape: bf16[12,32], index: 2, kind: input, shape index: {}]   ;;  %s689_s3 = inlined_call_operand.vmem [shape: bf16[4,32], index: 3, kind: input, shape index: {}]   ;;  %s690_s4 = inlined_call_operand.hbm [shape: f32[1,32], index: 4, kind: input, shape index: {}]   ;;  %s691_s5 = inlined_call_operand.vmem [shape: bf16[32,32], index: 5, kind: input, shape index: {}]   ;;  %s692_s6 = inlined_call_operand.hbm [shape: f32[1,32], index: 6, kind: input, shape index: {}]   ;;  %s693_s7 = inlined_call_operand.vmem [shape: bf16[32,128], index: 7, kind: input, shape index: {}]   ;;  %s694_s8 = inlined_call_operand.vmem [shape: f32[1,128], index: 8, kind: input, shape index: {}]   ;;  %s695_s9 = inlined_call_operand.hbm [shape: f32[8,128], index: 9, kind: output, shape index: {}]  }
   0x1   :  { %15 = vsyncpa [#allocation6], 0 }
   0x2   :  { %16 = vsyncpa [#allocation9], 0 }
   0x3   :  { %17 = vsyncpa [#allocation4], 0  ;;  %s540_s30 = smov [#allocation5]   ;;  %s422_s13 = scalar_lea.hbm %s688_s2, 128 }
   0x4   :  { %s35_s10 = sshll.u32 %s540_s30, 4  ;;  %p423_p0 = scmp.ne.s32.totalorder %s688_s2, %s422_s13  ;;  %s36_s10 = int_to_ptr.vmem [resolvable:$true] %s35_s10 }
   0x5   :  { %p426_p1 = scmp.lt.u32.totalorder %s422_s13, %s688_s2 }
   0x7   :  { %p428_p2 = pnand %p426_p1, %p423_p0 }
   0x9   :  { %431 = shalt.err (!%p428_p2)
}
   0xa   :  { %s432_s18 = scalar_lea.vmem %s36_s10, 128  ;;  %p437_p4 = scmp.lt.s32.totalorder %s36_s10, %s36_s10 }
   0xb   :  { %p433_p3 = scmp.ne.s32.totalorder %s36_s10, %s432_s18  ;;  %p438_p5 = scmp.lt.s32.totalorder %s432_s18, %s432_s18 }
   0xd   :  { %p439_p6 = por %p438_p5, %p437_p4 }
   0xf   :  { %p440_p7 = pnand %p439_p6, %p433_p3 }
  0x11   :  { %443 = shalt.err (!%p440_p7)
}
  0x12   :  { %s541_s19 = smov 64   ;;  %s542_s20 = smov 4  }
  0x13   :  { %41 = dma.hbm_to_vmem [thread:$0]  %s688_s2, 128, %s36_s10, [#allocation6], %s541_s19, %s541_s19, %s542_s20  }
  0x14   :  { %s543_s23 = smov [#allocation2]   ;;  %s544_s25 = smov [#allocation7]  }
  0x15   :  { %s24_s24 = sshll.u32 %s543_s23, 4  ;;  %s50_s26 = sshll.u32 %s544_s25, 4  ;;  %s25_s24 = int_to_ptr.vmem [resolvable:$true] %s24_s24  ;;  %s51_s26 = int_to_ptr.vmem [resolvable:$true] %s50_s26 }
  0x16   :  { %s444_s29 = scalar_lea.hbm %s686_s0, 128 }
  0x17   :  { %p445_p8 = scmp.ne.s32.totalorder %s686_s0, %s444_s29  ;;  %p448_p9 = scmp.lt.u32.totalorder %s444_s29, %s686_s0 }
  0x19   :  { %p450_p10 = pnand %p448_p9, %p445_p8 }
  0x1b   :  { %453 = shalt.err (!%p450_p10)
}
  0x1c   :  { %s454_s2 = scalar_lea.vmem %s25_s24, 128  ;;  %p459_p12 = scmp.lt.s32.totalorder %s25_s24, %s25_s24 }
  0x1d   :  { %p455_p11 = scmp.ne.s32.totalorder %s25_s24, %s454_s2  ;;  %p460_p13 = scmp.lt.s32.totalorder %s454_s2, %s454_s2 }
  0x1f   :  { %p461_p0 = por %p460_p13, %p459_p12 }
  0x21   :  { %p462_p1 = pnand %p461_p0, %p455_p11 }
  0x23   :  { %465 = shalt.err (!%p462_p1)
}
  0x24   :  { %27 = dma.hbm_to_vmem [thread:$0]  %s686_s0, 128, %s25_s24, [#allocation3]  }
  0x25   :  { %s466_s17 = scalar_lea.hbm %s690_s4, 16 }
  0x26   :  { %p467_p2 = scmp.ne.s32.totalorder %s690_s4, %s466_s17  ;;  %p470_p3 = scmp.lt.u32.totalorder %s466_s17, %s690_s4 }
  0x28   :  { %p472_p4 = pnand %p470_p3, %p467_p2 }
  0x2a   :  { %475 = shalt.err (!%p472_p4)
}
  0x2b   :  { %s476_s22 = scalar_lea.vmem %s51_s26, 16  ;;  %s480_s23 = scalar_lea.vmem %s51_s26, 32 }
  0x2c   :  { %p477_p5 = scmp.ne.s32.totalorder %s51_s26, %s476_s22  ;;  %p481_p6 = scmp.lt.s32.totalorder %s51_s26, %s51_s26 }
  0x2d   :  { %p482_p7 = scmp.lt.s32.totalorder %s480_s23, %s476_s22 }
  0x2f   :  { %p483_p8 = por %p482_p7, %p481_p6 }
  0x31   :  { %p484_p9 = pnand %p483_p8, %p477_p5 }
  0x33   :  { %487 = shalt.err (!%p484_p9)
}
  0x34   :  { %53 = dma.hbm_to_vmem [thread:$0]  %s690_s4, 16, %s51_s26, [#allocation6]  }
  0x35   :  { %s545_s25 = smov [#allocation8]   ;;  %s488_s30 = scalar_lea.hbm %s692_s6, 16 }
  0x36   :  { %s62_s27 = sshll.u32 %s545_s25, 4  ;;  %p489_p10 = scmp.ne.s32.totalorder %s692_s6, %s488_s30  ;;  %s63_s27 = int_to_ptr.vmem [resolvable:$true] %s62_s27 }
  0x37   :  { %p492_p11 = scmp.lt.u32.totalorder %s488_s30, %s692_s6 }
  0x39   :  { %p494_p12 = pnand %p492_p11, %p489_p10 }
  0x3b   :  { %497 = shalt.err (!%p494_p12)
}
  0x3c   :  { %s498_s10 = scalar_lea.vmem %s63_s27, 16  ;;  %s502_s4 = scalar_lea.vmem %s63_s27, 32 }
  0x3d   :  { %p499_p13 = scmp.ne.s32.totalorder %s63_s27, %s498_s10  ;;  %p503_p0 = scmp.lt.s32.totalorder %s63_s27, %s63_s27 }
  0x3e   :  { %p504_p1 = scmp.lt.s32.totalorder %s502_s4, %s498_s10 }
  0x40   :  { %p505_p2 = por %p504_p1, %p503_p0 }
  0x42   :  { %p506_p3 = pnand %p505_p2, %p499_p13 }
  0x44   :  { %509 = shalt.err (!%p506_p3)
}
  0x45   :  { %65 = dma.hbm_to_vmem [thread:$0]  %s692_s6, 16, %s63_s27, [#allocation9]  }
  0x46   :  { %532 = dma.done.wait [#allocation3], 128  }
  0x47   :  { %533 = vsyncadd [#allocation3], 4294967168 }
  0x48   :  { %534 = dma.done.wait [#allocation6], 144  }
  0x49   :  { %535 = vsyncadd [#allocation6], 4294967152 }
  0x4a   :  { %536 = dma.done.wait [#allocation9], 16  }
  0x4b   :  { %537 = vsyncadd [#allocation9], 4294967280  ;;  %v546_v0 = vmov 0.0   ;;  %vm547_vm0 = vmmov 0   ;;  %vm94_vm1 = vcmask 1041408   ;;  %vm147_vm2 = vcmask 1045504  }
  0x4c   :  { %376 = vmatprep.subr.bf16.mxu0 %v546_v0  ;;  %382 = vmatprep.subr.bf16.mxu1 %v546_v0  ;;  %v89_v1 = vld [vmem:[%s689_s3] sm:$0x3]  ;;  %v413_v3 = vld [vmem:[#allocation5] sm:$0x3f]   ;;  %vm90_vm3 = vcmask 31744   ;;  %vm143_vm4 = vcmask 97280  }
  0x4d   :  { %378 = vmatprep.mubr.msk.bf16.mxu0 %vm547_vm0, %v546_v0  ;;  %384 = vmatprep.mubr.msk.bf16.mxu1 %vm547_vm0, %v546_v0  ;;  %v96_v2 = vsel %vm94_vm1, %v89_v1, 0  ;;  %v85_v4 = vld [vmem:[%s687_s1] sm:$0xff]  ;;  %v149_v7 = vsel %vm147_vm2, %v413_v3, 0  ;;  %v415_v10 = vld [vmem:[%s691_s5 + $0x8] sm:$0xff]   ;;  %v357_v15 = vld [vmem:[#allocation7] ss:$0 sm:$0xff] }
  0x4e   :  { %v83_v5 = vld [vmem:[#allocation2] sm:$0xff]  ;;  %377 = vmatpush3.bf16.msra.mxu0 %v96_v2  ;;  %v86_v6 = vpack.c.bf16 %v85_v4, %v85_v4  ;;  %383 = vmatpush3.bf16.msra.mxu1 %v149_v7  ;;  %vm224_vm5 = vcmask 261120   ;;  %v417_v25 = vld [vmem:[%s693_s7 + $0x8] sm:$0xff]   ;;  %v358_v26 = vld [vmem:[#allocation8] ss:$0 sm:$0xff]  ;;  %s548_s24 = smov [#allocation10]  }
  0x4f   :  { %v84_v8 = vpack.c.bf16 %v83_v5, %v83_v5  ;;  %388 = vmatprep.subr.bf16.mxu0 %v546_v0  ;;  %396 = vmatprep.subr.bf16.mxu1 %v546_v0  ;;  %v414_v9 = vld [vmem:[%s691_s5] sm:$0xff]   ;;  %s343_s25 = sshll.u32 %s548_s24, 4  ;;  %s344_s25 = int_to_ptr.vmem [resolvable:$true] %s343_s25 }
  0x50   :  { %v416_v24 = vld [vmem:[%s693_s7] sm:$0xff]   ;;  %s510_s7 = scalar_lea.vmem %s344_s25, 128  ;;  %p515_p5 = scmp.lt.s32.totalorder %s344_s25, %s344_s25 }
  0x51   :  { %379 = vmatmul.mubr.msk.bf16.vlgmr.msra.gmra.mrb[0].mxu0 %vm90_vm3, %v86_v6  ;;  %385 = vmatmul.mubr.msk.bf16.vlgmr.msra.gmra.mrb[0].mxu1 %vm143_vm4, %v84_v8  ;;  %v362_v34 = vld [vmem:[%s694_s8] ss:$0 sm:$0xff]  ;;  %p511_p4 = scmp.ne.s32.totalorder %s344_s25, %s510_s7  ;;  %p516_p6 = scmp.lt.s32.totalorder %s510_s7, %s510_s7 }
  0x52   :  { %392 = vmatprep.mubr.msk.bf16.mxu0 %vm547_vm0, %v546_v0  ;;  %400 = vmatprep.mubr.msk.bf16.mxu1 %vm547_vm0, %v546_v0 }
  0x53   :  { %389 = vmatpush3.bf16.msra.mxu0 %v414_v9  ;;  %397 = vmatpush3.bf16.msra.mxu1 %v416_v24  ;;  %p517_p7 = por %p516_p6, %p515_p5 }
  0x54   :  { %390 = vmatprep.subr.bf16.mxu0 %v546_v0  ;;  %398 = vmatprep.subr.bf16.mxu1 %v546_v0 }
  0x55   :  { %p518_p8 = pnand %p517_p7, %p511_p4 }
  0x57   :  { %391 = vmatpush3.bf16.msra.mxu0 %v415_v10  ;;  %399 = vmatpush3.bf16.msra.mxu1 %v417_v25 }
 0x124   :  { %v132_v11 = vpop.f32.mrb[0].mxu0  ;;  %v185_v14 = vpop.f32.mrb[0].mxu1 }
 0x125   :  { %v380_v12 = vpop.f32.mrb[1].mxu0  ;;  %v186_v16 = vadd.f32 %v185_v14, %v132_v11  ;;  %v386_v18 = vpop.f32.mrb[1].mxu1 }
 0x126   :  { %v135_v13 = vpop.f32.mrb[2].mxu0  ;;  %v188_v19 = vpop.f32.mrb[2].mxu1 }
 0x127   :  { %v381_v17 = vpop.f32.mrb[3].mxu0  ;;  %v198_v20 = vadd.f32 %v357_v15, %v186_v16  ;;  %v387_v21 = vpop.f32.mrb[3].mxu1 }
 0x129   :  { %418 = vtanh.f32 %v198_v20 }
 0x133   :  { %v419_v22 = vpop.eup %418 }
 0x134   :  { %v200_v23 = vpack.c.bf16 %v419_v22, %v419_v22 }
 0x136   :  { %393 = vmatmul.mubr.msk.bf16.vlgmr.msra.gmra.mrb[4].mxu0 %vm224_vm5, %v200_v23 }
 0x209   :  { %v262_v27 = vpop.f32.mrb[4].mxu0 }
 0x20a   :  { %v263_v28 = vadd.f32 %v358_v26, %v262_v27  ;;  %v394_v29 = vpop.f32.mrb[5].mxu0 }
 0x20b   :  { %v265_v30 = vpop.f32.mrb[6].mxu0 }
 0x20c   :  { %420 = vtanh.f32 %v263_v28  ;;  %v395_v31 = vpop.f32.mrb[7].mxu0 }
 0x216   :  { %v421_v32 = vpop.eup %420 }
 0x217   :  { %v269_v33 = vpack.c.bf16 %v421_v32, %v421_v32 }
 0x219   :  { %401 = vmatmul.mubr.msk.bf16.vlgmr.msra.gmra.mrb[4].mxu1 %vm224_vm5, %v269_v33 }
 0x2ec   :  { %v330_v35 = vpop.f32.mrb[4].mxu1 }
 0x2ed   :  { %v331_v36 = vadd.f32 %v362_v34, %v330_v35  ;;  %v402_v37 = vpop.f32.mrb[5].mxu1 }
 0x2ee   :  { %v333_v38 = vpop.f32.mrb[6].mxu1 }
 0x2ef   :  { %336 = vst [vmem:[#allocation10] sm:$0xff] %v331_v36  ;;  %v403_v39 = vpop.f32.mrb[7].mxu1 }
 0x2f0   :  { %521 = shalt.err (!%p518_p8)
}
 0x2f1   :  { %s522_s8 = scalar_lea.hbm %s695_s9, 128 }
 0x2f2   :  { %p523_p9 = scmp.ne.s32.totalorder %s695_s9, %s522_s8  ;;  %p526_p10 = scmp.lt.u32.totalorder %s522_s8, %s695_s9 }
 0x2f4   :  { %p528_p11 = pnand %p526_p10, %p523_p9 }
 0x2f6   :  { %531 = shalt.err (!%p528_p11)
}
 0x2f7   :  { %346 = dma.vmem_to_hbm [thread:$0]  %s344_s25, 128, %s695_s9, [#allocation4]  }
 0x2f8   :  { %538 = dma.done.wait [#allocation4], 128  }
 0x2f9   :  { %539 = vsyncadd [#allocation4], 4294967168 }
 0x2fa   :  { %350 = vsyncpa [#allocation3], 1 }
 0x2fb   :  { %351 = vsyncpa [#allocation6], 1 }
 0x2fc   :  { %352 = vsyncpa [#allocation9], 1 }
 0x2fd   :  { %353 = vsyncpa [#allocation4], 1 }

</bundles_post_ra>
